<compile_context>
chip_gen: v7x
topology: tpu7x:2x2x1
jax: 0.10.0
libtpu: 0.0.40
codegen_flags: <defaults>
</compile_context>

<pallas_src>
import functools

import jax
import jax.numpy as jnp
from jax.experimental import pallas as pl
from jax.experimental.pallas import tpu as pltpu

EPS = 1e-5
COMPUTE_DTYPE = jnp.bfloat16            # MXU operand / inter-layer activation dtype
VMEM_LIMIT = 32 * 1024 * 1024           # explicit VMEM budget (safe on v5e/v6e/v7x)
_DIRECT_CONV_MAX_PIXELS = 4096          # f32 (H*W, tn) accumulator must stay small in VMEM


def _round_up(x, m):
    return ((x + m - 1) // m) * m


def _choose_tm(m):
    if m >= 4096:
        return 512
    if m >= 512:
        return 256
    return 128


def _choose_tn(np_):
    return 256 if np_ % 256 == 0 else 128


def _choose_tk(kp):
    if kp <= 1024:
        return kp
    for c in range(1024, 127, -128):        # largest multiple of 128 that divides Kp
        if kp % c == 0:
            return c
    return 128


def _choose_ct(cin, hp, w, kw):
    ct = cin
    for c in (512, 256, 128):
        if cin % c == 0:
            ct = c
            break
    # keep the streamed (kw, hp, w, ct) bf16 input block comfortably inside VMEM
    while ct > 128 and cin % (ct // 2) == 0 and kw * hp * w * ct * 2 > 6 * 1024 * 1024:
        ct //= 2
    return ct


# ----------------------------------------------------------------------------
# Pallas kernels
# ----------------------------------------------------------------------------
def _matmul_bn_act_kernel(*refs, apply_relu, has_residual):
    """acc += A @ B ; epilogue: y = acc*scale + bias (+ residual) (+ ReLU)."""
    if has_residual:
        a_ref, b_ref, s_ref, bias_ref, r_ref, o_ref, acc_ref = refs
    else:
        a_ref, b_ref, s_ref, bias_ref, o_ref, acc_ref = refs
        r_ref = None

    @pl.when(pl.program_id(2) == 0)
    def _():
        acc_ref[...] = jnp.zeros_like(acc_ref)

    acc_ref[...] += jnp.dot(a_ref[...], b_ref[...], preferred_element_type=jnp.float32)

    @pl.when(pl.program_id(2) == pl.num_programs(2) - 1)
    def _():
        y = acc_ref[...] * s_ref[...] + bias_ref[...]
        if has_residual:
            y = y + r_ref[...].astype(jnp.float32)
        if apply_relu:
            y = jnp.maximum(y, 0.0)
        o_ref[...] = y.astype(o_ref.dtype)


def _conv3x3_kernel(x_ref, w_ref, s_ref, b_ref, o_ref, acc_ref, *, dil, h, w, apply_relu):
    """'same' 3x3 stride-1 conv: the 9 taps are accumulated in-kernel.

    x_ref : (3, h + 2*dil, w, ct)   -- 3 W-shifted copies of the padded input
    w_ref : (9, ct, tn)             -- weight slab for this (cin, cout) tile
    o_ref : (1, h*w, tn)
    """
    @pl.when(pl.program_id(2) == 0)
    def _():
        acc_ref[...] = jnp.zeros_like(acc_ref)

    ct = x_ref.shape[-1]
    acc = acc_ref[...]
    for ki in range(3):
        for kj in range(3):
            a = x_ref[kj, ki * dil:ki * dil + h, :, :]          # (h, w, ct)
            a = a.reshape(h * w, ct)
            acc = acc + jnp.dot(a, w_ref[ki * 3 + kj], preferred_element_type=jnp.float32)
    acc_ref[...] = acc

    @pl.when(pl.program_id(2) == pl.num_programs(2) - 1)
    def _():
        y = acc_ref[...] * s_ref[...] + b_ref[...]
        if apply_relu:
            y = jnp.maximum(y, 0.0)
        o_ref[0, :, :] = y.astype(o_ref.dtype)


def _mean_reduce_kernel(x_ref, o_ref):
    o_ref[...] = jnp.mean(x_ref[...].astype(jnp.float32), axis=1, keepdims=True)


# ----------------------------------------------------------------------------
# Pallas wrappers
# ----------------------------------------------------------------------------
def _fused_matmul(a, w2, scale, bias, residual, relu):
    """act((a @ w2)*scale + bias [+ residual]).  w2/scale/bias are pre-padded to (Kp, Np)."""
    m, k = a.shape
    kp, np_ = w2.shape
    tm, tn, tk = _choose_tm(m), _choose_tn(np_), _choose_tk(kp)
    mp = _round_up(m, tm)
    a = a.astype(COMPUTE_DTYPE)
    if (mp, kp) != (m, k):
        a = jnp.pad(a, ((0, mp - m), (0, kp - k)))
    s2 = scale.reshape(1, np_)
    b2 = bias.reshape(1, np_)

    in_specs = [
        pl.BlockSpec((tm, tk), lambda i, j, kk: (i, kk)),
        pl.BlockSpec((tk, tn), lambda i, j, kk: (kk, j)),
        pl.BlockSpec((1, tn), lambda i, j, kk: (0, j)),
        pl.BlockSpec((1, tn), lambda i, j, kk: (0, j)),
    ]
    args = [a, w2, s2, b2]
    has_res = residual is not None
    if has_res:
        r = residual.astype(COMPUTE_DTYPE).reshape(m, -1)
        r = jnp.pad(r, ((0, mp - m), (0, np_ - r.shape[1])))
        in_specs.append(pl.BlockSpec((tm, tn), lambda i, j, kk: (i, j)))
        args.append(r)

    out = pl.pallas_call(
        functools.partial(_matmul_bn_act_kernel, apply_relu=relu, has_residual=has_res),
        out_shape=jax.ShapeDtypeStruct((mp, np_), COMPUTE_DTYPE),
        grid_spec=pltpu.PrefetchScalarGridSpec(
            num_scalar_prefetch=0,
            grid=(mp // tm, np_ // tn, kp // tk),
            in_specs=in_specs,
            out_specs=pl.BlockSpec((tm, tn), lambda i, j, kk: (i, j)),
            scratch_shapes=[pltpu.VMEM((tm, tn), jnp.float32)],
        ),
        compiler_params=pltpu.CompilerParams(
            dimension_semantics=("parallel", "parallel", "arbitrary"),
            vmem_limit_bytes=VMEM_LIMIT,
        ),
    )(*args)
    return out[:m]


@functools.partial(jax.jit,
                   static_argnames=("kh", "kw", "stride", "padding", "dilation", "relu", "cout"))
def _conv_im2col(x, w2, scale, bias, residual, *, kh, kw, stride, padding, dilation, relu, cout):
    """General Conv+BN(+residual)(+ReLU) via im2col matmul (used for 1x1 and strided convs)."""
    n, h, w, cin = x.shape
    oh = (h + 2 * padding - dilation * (kh - 1) - 1) // stride + 1
    ow = (w + 2 * padding - dilation * (kw - 1) - 1) // stride + 1
    xb = x.astype(COMPUTE_DTYPE)
    if padding:
        xb = jnp.pad(xb, ((0, 0), (padding, padding), (padding, padding), (0, 0)))
    if kh == 1 and kw == 1:
        a = xb[:, ::stride, ::stride, :][:, :oh, :ow, :].reshape(n * oh * ow, cin)
    else:
        cols = [xb[:, i * dilation:i * dilation + (oh - 1) * stride + 1:stride,
                   j * dilation:j * dilation + (ow - 1) * stride + 1:stride, :]
                for i in range(kh) for j in range(kw)]
        a = jnp.concatenate(cols, axis=-1).reshape(n * oh * ow, kh * kw * cin)
    r = residual.reshape(n * oh * ow, residual.shape[-1]) if residual is not None else None
    out = _fused_matmul(a, w2, scale, bias, r, relu)
    return out[:, :cout].reshape(n, oh, ow, cout)


@functools.partial(jax.jit, static_argnames=("dilation", "relu", "cout"))
def _conv3x3_direct(x, w3, scale, bias, *, dilation, relu, cout):
    """'same' 3x3 stride-1 conv + BN + optional ReLU with in-kernel tap accumulation."""
    n, h, w, cin = x.shape
    taps, _, np_ = w3.shape
    pad = dilation
    hp = h + 2 * pad
    xb = jnp.pad(x.astype(COMPUTE_DTYPE), ((0, 0), (pad, pad), (pad, pad), (0, 0)))
    # pre-shift only along W (3 copies); the 3 H-taps are sliced inside the kernel.
    xs = jnp.stack([xb[:, :, j * dilation:j * dilation + w, :] for j in range(3)], axis=0)
    xs = xs.reshape(3, n * hp, w, cin)

    tn = _choose_tn(np_)
    ct = _choose_ct(cin, hp, w, 3)

    out = pl.pallas_call(
        functools.partial(_conv3x3_kernel, dil=dilation, h=h, w=w, apply_relu=relu),
        out_shape=jax.ShapeDtypeStruct((n, h * w, np_), COMPUTE_DTYPE),
        grid_spec=pltpu.PrefetchScalarGridSpec(
            num_scalar_prefetch=0,
            grid=(n, np_ // tn, cin // ct),
            in_specs=[
                pl.BlockSpec((3, hp, w, ct), lambda b, j, k: (0, b, 0, k)),
                pl.BlockSpec((taps, ct, tn), lambda b, j, k: (0, k, j)),
                pl.BlockSpec((1, tn), lambda b, j, k: (0, j)),
                pl.BlockSpec((1, tn), lambda b, j, k: (0, j)),
            ],
            out_specs=pl.BlockSpec((1, h * w, tn), lambda b, j, k: (b, 0, j)),
            scratch_shapes=[pltpu.VMEM((h * w, tn), jnp.float32)],
        ),
        compiler_params=pltpu.CompilerParams(
            dimension_semantics=("parallel", "parallel", "arbitrary"),
            vmem_limit_bytes=VMEM_LIMIT,
        ),
    )(xs, w3, scale.reshape(1, np_), bias.reshape(1, np_))
    return out[:, :, :cout].reshape(n, h, w, cout)


@jax.jit
def max_pool_3x3_s2(x):
    """MaxPool2d(3, stride=2, padding=1) on NHWC: max of 9 shifted strided slices.
    Plain jnp so XLA fuses the slices into one pass (no 9x patch tensor -- per perf review)."""
    n, h, w, c = x.shape
    xp = jnp.pad(x, ((0, 0), (1, 1), (1, 1), (0, 0)), constant_values=-jnp.inf)
    oh = (h - 1) // 2 + 1
    ow = (w - 1) // 2 + 1
    out = None
    for i in range(3):
        for j in range(3):
            s = xp[:, i:i + 2 * oh - 1:2, j:j + 2 * ow - 1:2, :]
            out = s if out is None else jnp.maximum(out, s)
    return out


@jax.jit
def global_avg_pool(x):
    """AdaptiveAvgPool2d((1,1)) on NHWC -> [N,1,1,C] (f32 accumulation inside the kernel)."""
    n, h, w, c = x.shape
    tc = 256 if c % 256 == 0 else (128 if c % 128 == 0 else c)
    xr = x.reshape(n, h * w, c)
    out = pl.pallas_call(
        _mean_reduce_kernel,
        out_shape=jax.ShapeDtypeStruct((n, 1, c), jnp.float32),
        grid_spec=pltpu.PrefetchScalarGridSpec(
            num_scalar_prefetch=0,
            grid=(n, c // tc),
            in_specs=[pl.BlockSpec((1, h * w, tc), lambda b, j: (b, 0, j))],
            out_specs=pl.BlockSpec((1, 1, tc), lambda b, j: (b, 0, j)),
        ),
        compiler_params=pltpu.CompilerParams(dimension_semantics=("parallel", "parallel")),
    )(xr)
    return out.reshape(n, 1, 1, c)


@functools.partial(jax.jit, static_argnums=(1, 2))
def bilinear_resize(x, oh, ow):
    """F.interpolate(mode='bilinear', align_corners=True) as jnp gather + lerp.
    (Tiny, memory-bound; a K<=16 MXU matmul + transposes wastes >90% of the work -- review.)"""
    n, h, w, c = x.shape
    if (oh, ow) == (h, w):
        return x

    def axis_lerp(t, in_size, out_size, axis):
        if out_size == in_size:
            return t.astype(jnp.float32)
        if in_size == 1:
            return jnp.repeat(t.astype(jnp.float32), out_size, axis=axis)
        src = jnp.arange(out_size, dtype=jnp.float32) * ((in_size - 1) / (out_size - 1))
        i0 = jnp.clip(jnp.floor(src).astype(jnp.int32), 0, in_size - 2)
        frac = (src - i0.astype(jnp.float32))
        shape = [1] * t.ndim
        shape[axis] = out_size
        frac = frac.reshape(shape)
        g0 = jnp.take(t, i0, axis=axis).astype(jnp.float32)
        g1 = jnp.take(t, i0 + 1, axis=axis).astype(jnp.float32)
        return g0 * (1.0 - frac) + g1 * frac

    y = axis_lerp(x, h, oh, 1)
    y = axis_lerp(y, w, ow, 2)
    return y.astype(x.dtype)


# ----------------------------------------------------------------------------
# Conv dispatcher
# ----------------------------------------------------------------------------
_DIRECT_CONV_OK = True   # safety net: fall back to im2col if the direct kernel fails to lower


def _w2_from_w3(w3):
    taps, cin, np_ = w3.shape
    k = taps * cin
    kp = _round_up(k, 128)
    return jnp.pad(w3.reshape(k, np_), ((0, kp - k), (0, 0)))


def conv_bn_act(x, p, *, stride=1, padding=0, dilation=1, relu=True, residual=None):
    """Conv2d(bias=False) + BatchNorm(eval) + optional residual add + optional ReLU (NHWC)."""
    global _DIRECT_CONV_OK
    kh, kw, cout = p["kh"], p["kw"], p["cout"]
    n, h, w, _ = x.shape
    if ("w3" in p and _DIRECT_CONV_OK and stride == 1 and padding == dilation
            and residual is None and w % 8 == 0 and h * w <= _DIRECT_CONV_MAX_PIXELS):
        try:
            return _conv3x3_direct(x, p["w3"], p["scale"], p["bias"],
                                   dilation=dilation, relu=relu, cout=cout)
        except Exception:   # pragma: no cover - Mosaic rejection on some TPU gen -> im2col path
            _DIRECT_CONV_OK = False
    w2 = p.get("w2")
    if w2 is None:
        w2 = _w2_from_w3(p["w3"])
    return _conv_im2col(x, w2, p["scale"], p["bias"], residual,
                        kh=kh, kw=kw, stride=stride, padding=padding,
                        dilation=dilation, relu=relu, cout=cout)


# ----------------------------------------------------------------------------
# Parameter construction (matches _init_weight: conv ~ N(0,0.01), BN gamma=1 beta=0)
# Weights are pre-reshaped, pre-padded and pre-cast to bf16 at build time.
# ----------------------------------------------------------------------------
class KeyGen:
    def __init__(self, key):
        self.key = key

    def next(self):
        self.key, sub = jax.random.split(self.key)
        return sub


def conv_bn_params(kg, kh, kw, cin, cout, stride=1):
    w = jax.random.normal(kg.next(), (kh, kw, cin, cout), jnp.float32) * 0.01
    gamma = jnp.ones((cout,), jnp.float32)
    beta = jnp.zeros((cout,), jnp.float32)
    running_mean = jnp.zeros((cout,), jnp.float32)
    running_var = jnp.ones((cout,), jnp.float32)
    scale = gamma / jnp.sqrt(running_var + EPS)
    bias = beta - running_mean * scale

    np_ = _round_up(cout, 128)
    p = {"kh": kh, "kw": kw, "cin": cin, "cout": cout,
         "scale": jnp.pad(scale, (0, np_ - cout)),
         "bias": jnp.pad(bias, (0, np_ - cout))}
    if kh == 3 and stride == 1:
        # direct tap-accumulation form: (9, cin, Np)
        w3 = jnp.pad(w, ((0, 0), (0, 0), (0, 0), (0, np_ - cout))).reshape(kh * kw, cin, np_)
        p["w3"] = w3.astype(COMPUTE_DTYPE)
    else:
        k = kh * kw * cin
        kp = _round_up(k, 128)
        w2 = jnp.pad(w.reshape(k, cout), ((0, kp - k), (0, np_ - cout)))
        p["w2"] = w2.astype(COMPUTE_DTYPE)
    return p


def bottleneck_params(kg, inplanes, planes, downsample, stride):
    return {
        "conv1": conv_bn_params(kg, 1, 1, inplanes, planes),
        "conv2": conv_bn_params(kg, 3, 3, planes, planes, stride=stride),
        "conv3": conv_bn_params(kg, 1, 1, planes, planes * 4),
        "downsample": conv_bn_params(kg, 1, 1, inplanes, planes * 4, stride=stride)
        if downsample else None,
    }


def layer_params(kg, inplanes, planes, blocks, stride):
    ps = [bottleneck_params(kg, inplanes, planes, True, stride)]
    for _ in range(blocks - 1):
        ps.append(bottleneck_params(kg, planes * 4, planes, False, 1))
    return ps


def resnet_params(kg, blocks):
    return {
        "conv1": conv_bn_params(kg, 3, 3, 3, 64, stride=2),     # deep stem: 3x3 s2
        "conv2": conv_bn_params(kg, 3, 3, 64, 64),
        "conv3": conv_bn_params(kg, 3, 3, 64, 128),
        "layer1": layer_params(kg, 128, 64, blocks[0], 1),
        "layer2": layer_params(kg, 256, 128, blocks[1], 2),
        "layer3": layer_params(kg, 512, 256, blocks[2], 1),     # dilated, stride 1
        "layer4": layer_params(kg, 1024, 512, blocks[3], 1),    # dilated, stride 1
    }


def head_params(kg):
    in_dim, rdim = 2048, 256
    aspp = []
    for rate in (1, 6, 12, 18):
        k = 1 if rate == 1 else 3
        aspp.append(conv_bn_params(kg, k, k, in_dim, rdim))
    aspp.append(conv_bn_params(kg, 1, 1, in_dim, rdim))  # image-pool branch
    return {
        "aspp": aspp,
        "conv_layer": conv_bn_params(kg, 1, 1, rdim * 5, rdim),
        "low_conv": conv_bn_params(kg, 1, 1, 256, rdim),
        "last_conv": [conv_bn_params(kg, 3, 3, rdim * 2, rdim),
                      conv_bn_params(kg, 3, 3, rdim, rdim)],
    }


def build_params(key, layers=50):
    blocks = {50: (3, 4, 6, 3), 101: (3, 4, 23, 3), 152: (3, 8, 36, 3)}[layers]
    kg = KeyGen(key)
    return {
        "rgb": resnet_params(kg, blocks),
        "thermal": resnet_params(kg, blocks),
        "head_rgb": head_params(kg),
        "head_thermal": head_params(kg),   # its low_conv is unused (original-code behaviour)
        "fused_conv": [conv_bn_params(kg, 3, 3, 512, 256),
                       conv_bn_params(kg, 3, 3, 256, 256)],
    }


# ----------------------------------------------------------------------------
# Model forward
# ----------------------------------------------------------------------------
def bottleneck_fwd(p, x, stride, dilation):
    out = conv_bn_act(x, p["conv1"], relu=True)
    out = conv_bn_act(out, p["conv2"], stride=stride, padding=dilation, dilation=dilation,
                      relu=True)
    if p["downsample"] is not None:
        identity = conv_bn_act(x, p["downsample"], stride=stride, relu=False)
    else:
        identity = x
    # conv3 + BN + residual add + ReLU fused in one Pallas epilogue
    return conv_bn_act(out, p["conv3"], relu=True, residual=identity)


def layer_fwd(ps, x, stride, dilation):
    x = bottleneck_fwd(ps[0], x, stride, dilation)
    for p in ps[1:]:
        x = bottleneck_fwd(p, x, 1, dilation)
    return x


def backbone_fwd(p, x):
    x = conv_bn_act(x, p["conv1"], stride=2, padding=1, relu=True)
    x = conv_bn_act(x, p["conv2"], stride=1, padding=1, relu=True)
    x = conv_bn_act(x, p["conv3"], stride=1, padding=1, relu=True)
    x = max_pool_3x3_s2(x)
    x = layer_fwd(p["layer1"], x, 1, 1)
    low = x
    x = layer_fwd(p["layer2"], x, 2, 1)
    x = layer_fwd(p["layer3"], x, 1, 2)   # dilation 2, stride 1 (modified)
    x = layer_fwd(p["layer4"], x, 1, 4)   # dilation 4, stride 1 (modified)
    return low, x


def aspp_decoder_fwd(head, x, low, low_conv_p):
    n, h, w, _ = x.shape
    outs = []
    for i, rate in enumerate((1, 6, 12, 18)):
        if rate == 1:
            o = conv_bn_act(x, head["aspp"][i], relu=True)
        else:
            o = conv_bn_act(x, head["aspp"][i], padding=rate, dilation=rate, relu=True)
        outs.append(o)   # F.interpolate to the same spatial size is the identity
    pooled = global_avg_pool(x)                                  # [N,1,1,2048]
    o = conv_bn_act(pooled, head["aspp"][4], relu=True)          # [N,1,1,256]
    # bilinear upsample of a 1x1 map with align_corners=True is a pure broadcast
    outs.append(jnp.broadcast_to(o, (n, h, w, o.shape[-1])))
    y = conv_bn_act(jnp.concatenate(outs, axis=-1), head["conv_layer"], relu=True)  # dropout=id
    low_f = conv_bn_act(low, low_conv_p, relu=True)
    y = bilinear_resize(y, low_f.shape[1], low_f.shape[2])
    y = jnp.concatenate([y, low_f], axis=-1)
    y = conv_bn_act(y, head["last_conv"][0], padding=1, relu=True)                  # dropout=id
    y = conv_bn_act(y, head["last_conv"][1], padding=1, relu=True)
    return y


def deeplab_forward(params, x_nchw, thermal_nchw):
    x = jnp.transpose(x_nchw, (0, 2, 3, 1))
    t = jnp.transpose(thermal_nchw, (0, 2, 3, 1))

    # RGB stream
    low, xf = backbone_fwd(params["rgb"], x)
    x_out = aspp_decoder_fwd(params["head_rgb"], xf, low, params["head_rgb"]["low_conv"])

    # Thermal stream (original forward uses the RGB low_conv on thermal low-level features)
    low_t, tf = backbone_fwd(params["thermal"], t)
    t_out = aspp_decoder_fwd(params["head_thermal"], tf, low_t,
                             params["head_rgb"]["low_conv"])

    # Fusion stream
    fused = jnp.concatenate([x_out, t_out], axis=-1)
    fused = conv_bn_act(fused, params["fused_conv"][0], padding=1, relu=True)       # dropout=id
    fused = conv_bn_act(fused, params["fused_conv"][1], padding=1, relu=True)

    to_nchw = lambda a: jnp.transpose(a, (0, 3, 1, 2)).astype(jnp.float32)
    return to_nchw(x_out), to_nchw(t_out), to_nchw(fused)


# ----------------------------------------------------------------------------
if __name__ == "__main__":
    key = jax.random.PRNGKey(0)
    kx, kt = jax.random.split(key)
    N, C, H, W = 2, 3, 64, 64
    x = jax.random.normal(kx, (N, C, H, W), jnp.float32)
    thermal = jax.random.normal(kt, (N, C, H, W), jnp.float32)

    params = build_params(jax.random.PRNGKey(42), layers=50)

    rgb_out, th_out, fused_out = deeplab_forward(params, x, thermal)
    jax.block_until_ready((rgb_out, th_out, fused_out))

    assert rgb_out.shape == (N, 256, H // 4, W // 4)
    assert th_out.shape == (N, 256, H // 4, W // 4)
    assert fused_out.shape == (N, 256, H // 4, W // 4)
    assert bool(jnp.all(jnp.isfinite(fused_out)))
    print("KERNEL_OK")
</pallas_src>

<mosaic_0001>
module attributes {stable_mosaic.version = 11 : i64} {
  func.func @_matmul_bn_act_kernel(%arg0: i32, %arg1: i32, %arg2: i32, %arg3: memref<256x128xbf16, #tpu.memory_space<vmem>>, %arg4: memref<128x128xbf16, #tpu.memory_space<vmem>>, %arg5: memref<1x128xf32, #tpu.memory_space<vmem>>, %arg6: memref<1x128xf32, #tpu.memory_space<vmem>>, %arg7: memref<256x128xbf16, #tpu.memory_space<vmem>>, %arg8: memref<256x128xf32, #tpu.memory_space<vmem>>) attributes {dimension_semantics = [#tpu.dimension_semantics<parallel>, #tpu.dimension_semantics<parallel>, #tpu.dimension_semantics<arbitrary>], iteration_bounds = array<i64: 8, 1, 1>, scalar_prefetch = 0 : i64, scratch_operands = 1 : i64, tpu.core_type = #tpu.core_type<tc>, window_params = [{transform_indices = @transform_0, window_bounds = array<i64: 256, 128>}, {transform_indices = @transform_1, window_bounds = array<i64: 128, 128>}, {transform_indices = @transform_2, window_bounds = array<i64: 1, 128>}, {transform_indices = @transform_3, window_bounds = array<i64: 1, 128>}, {transform_indices = @transform_4, window_bounds = array<i64: 256, 128>}]} {
    %c0_i32 = arith.constant 0 : i32
    %0 = arith.cmpi eq, %arg2, %c0_i32 : i32
    %1 = arith.extui %0 : i1 to i32
    %c0_i32_0 = arith.constant 0 : i32
    %2 = arith.cmpi ne, %1, %c0_i32_0 : i32
    scf.if %2 {
      %cst_10 = arith.constant 0.000000e+00 : f32
      %12 = vector.broadcast %cst_10 : f32 to vector<256x128xf32>
      %c0_11 = arith.constant 0 : index
      %c0_12 = arith.constant 0 : index
      %13 = vector.load %arg8[%c0_11, %c0_12] : memref<256x128xf32, #tpu.memory_space<vmem>>, vector<256x128xf32>
      tpu.vector_store %arg8[%c0_11, %c0_12], %12 {strides = array<i32>} : memref<256x128xf32, #tpu.memory_space<vmem>>, vector<256x128xf32>,
    } else {
    }
    %c0 = arith.constant 0 : index
    %c0_1 = arith.constant 0 : index
    %3 = vector.load %arg8[%c0, %c0_1] : memref<256x128xf32, #tpu.memory_space<vmem>>, vector<256x128xf32>
    %c0_2 = arith.constant 0 : index
    %c0_3 = arith.constant 0 : index
    %4 = vector.load %arg3[%c0_2, %c0_3] : memref<256x128xbf16, #tpu.memory_space<vmem>>, vector<256x128xbf16>
    %c0_4 = arith.constant 0 : index
    %c0_5 = arith.constant 0 : index
    %5 = vector.load %arg4[%c0_4, %c0_5] : memref<128x128xbf16, #tpu.memory_space<vmem>>, vector<128x128xbf16>
    %cst = arith.constant dense<0.000000e+00> : vector<256x128xf32>
    %6 = tpu.matmul %4, %5, %cst {dimension_numbers = #tpu.dot_dimension_numbers<[1], [0], [0], [1], [0, 0, 1, 1], [], []>} : vector<256x128xbf16>, vector<128x128xbf16>, vector<256x128xf32> -> vector<256x128xf32>
    %7 = arith.addf %3, %6 : vector<256x128xf32>
    %c0_6 = arith.constant 0 : index
    %c0_7 = arith.constant 0 : index
    %8 = vector.load %arg8[%c0_6, %c0_7] : memref<256x128xf32, #tpu.memory_space<vmem>>, vector<256x128xf32>
    tpu.vector_store %arg8[%c0_6, %c0_7], %7 {strides = array<i32>} : memref<256x128xf32, #tpu.memory_space<vmem>>, vector<256x128xf32>,
    %c0_i32_8 = arith.constant 0 : i32
    %9 = arith.cmpi eq, %arg2, %c0_i32_8 : i32
    %10 = arith.extui %9 : i1 to i32
    %c0_i32_9 = arith.constant 0 : i32
    %11 = arith.cmpi ne, %10, %c0_i32_9 : i32
    scf.if %11 {
      %c0_10 = arith.constant 0 : index
      %c0_11 = arith.constant 0 : index
      %12 = vector.load %arg8[%c0_10, %c0_11] : memref<256x128xf32, #tpu.memory_space<vmem>>, vector<256x128xf32>
      %c0_12 = arith.constant 0 : index
      %c0_13 = arith.constant 0 : index
      %13 = vector.load %arg5[%c0_12, %c0_13] : memref<1x128xf32, #tpu.memory_space<vmem>>, vector<1x128xf32>
      %14 = vector.broadcast %13 : vector<1x128xf32> to vector<256x128xf32>
      %15 = arith.mulf %12, %14 : vector<256x128xf32>
      %c0_14 = arith.constant 0 : index
      %c0_15 = arith.constant 0 : index
      %16 = vector.load %arg6[%c0_14, %c0_15] : memref<1x128xf32, #tpu.memory_space<vmem>>, vector<1x128xf32>
      %17 = vector.broadcast %16 : vector<1x128xf32> to vector<256x128xf32>
      %18 = arith.addf %15, %17 : vector<256x128xf32>
      %cst_16 = arith.constant 0.000000e+00 : f32
      %19 = vector.broadcast %cst_16 : f32 to vector<256x128xf32>
      %20 = arith.maximumf %18, %19 : vector<256x128xf32>
      %21 = arith.truncf %20 : vector<256x128xf32> to vector<256x128xbf16>
      %c0_17 = arith.constant 0 : index
      %c0_18 = arith.constant 0 : index
      %22 = vector.load %arg7[%c0_17, %c0_18] : memref<256x128xbf16, #tpu.memory_space<vmem>>, vector<256x128xbf16>
      tpu.vector_store %arg7[%c0_17, %c0_18], %21 {strides = array<i32>} : memref<256x128xbf16, #tpu.memory_space<vmem>>, vector<256x128xbf16>,
    } else {
    }
    return
  }
  func.func @transform_0(%arg0: i32, %arg1: i32, %arg2: i32) -> (i32, i32) {
    %c0_i32 = arith.constant 0 : i32
    return %arg0, %arg2 : i32, i32
  }
  func.func @transform_1(%arg0: i32, %arg1: i32, %arg2: i32) -> (i32, i32) {
    %c0_i32 = arith.constant 0 : i32
    return %arg2, %arg1 : i32, i32
  }
  func.func @transform_2(%arg0: i32, %arg1: i32, %arg2: i32) -> (i32, i32) {
    %c0_i32 = arith.constant 0 : i32
    %c0_i32_0 = arith.constant 0 : i32
    return %c0_i32, %arg1 : i32, i32
  }
  func.func @transform_3(%arg0: i32, %arg1: i32, %arg2: i32) -> (i32, i32) {
    %c0_i32 = arith.constant 0 : i32
    %c0_i32_0 = arith.constant 0 : i32
    return %c0_i32, %arg1 : i32, i32
  }
  func.func @transform_4(%arg0: i32, %arg1: i32, %arg2: i32) -> (i32, i32) {
    %c0_i32 = arith.constant 0 : i32
    return %arg0, %arg1 : i32, i32
  }
}

</mosaic_0001>

<bundles_post_ra>
// kernel: _conv_im2col.1
= control target key start
LH: loop header
LB: loop body
LE: loop exit
PB: predicated region body
PF: predicated region fallthrough
CT: control target
= control target key end

     0   :  { %9 = vsyncpa [#allocation4], 0  ;;  %s1950_s0 = inlined_call_operand.vmem [shape: bf16[2048,128], index: 0, kind: input, shape index: {}]   ;;  %s1951_s1 = inlined_call_operand.vmem [shape: bf16[128,128], index: 1, kind: input, shape index: {}]   ;;  %s1952_s2 = inlined_call_operand.vmem [shape: f32[1,128], index: 2, kind: input, shape index: {}]   ;;  %s1953_s3 = inlined_call_operand.vmem [shape: f32[1,128], index: 3, kind: input, shape index: {}]   ;;  %s1954_s4 = inlined_call_operand.hbm [shape: bf16[2048,128], index: 4, kind: output, shape index: {}]  }
   0x1   :  { %11 = vsyncpa [#allocation4 + $0x1], 0  ;;  %s1697_s15 = smov 0   ;;  %s1699_s16 = smov 0  }
   0x2   :  { %s1701_s17 = smov 0   ;;  %s1703_s18 = smov 0  }
   0x3   :  { %s1705_s19 = smov 0   ;;  %s1707_s20 = smov 0  }
   0x4 LB: > { %s1218_s21 = sadd.s32 4294967295, %s1667_s20   ;;  %s1219_s22 = sadd.s32 4294967294, %s1667_s20   ;;  %s1667_s20 = sphi %s1707_s20, %s17_s20   ;;  %s1663_s19 = sphi %s1705_s19, %s1961_s19   ;;  %s1659_s18 = sphi %s1703_s18, %s1960_s18   ;;  %s1655_s17 = sphi %s1701_s17, %s1959_s17   ;;  %s1651_s16 = sphi %s1699_s16, %s1958_s16   ;;  %s1647_s15 = sphi %s1697_s15, %s1957_s15  }
   0x5   : > { %s36_s23 = sadd.s32 1, %s1663_s19  ;;  %s153_s24 = sadd.s32 1, %s1655_s17 }
   0x6   : > { %p38_p0 = scmp.ge.s32.totalorder %s36_s23, 8  ;;  %p163_p1 = scmp.ne.s32.totalorder %s1655_s17, %s1651_s16 }
   0x7   : > { %p164_p2 = scmp.eq.s32.totalorder %s1218_s21, 7  ;;  %p169_p3 = scmp.ne.s32.totalorder %s1651_s16, %s1647_s15 }
   0x8   : > { %s1963_s23 = smov (%p38_p0, %s36_s23), 0  ;;  %p170_p5 = scmp.eq.s32.totalorder %s1219_s22, 7 }
   0x9   : > { %p1737_p4 = por %p164_p2, %p163_p1  ;;  %s148_s26 = ssub.s32 %s1663_s19, %s1963_s23 }
   0xa   : > { %p1225_p6 = scmp.ge.s32.totalorder %s1667_s20, 1  ;;  %p151_p7 = scmp.eq.s32.totalorder %s148_s26, 0 }
   0xb   : > { %p1744_p8 = por %p170_p5, %p169_p3  ;;  %p224_p9 = scmp.lt.s32.totalorder %s1667_s20, 9 }
   0xc   : > { %s1750_s28 = scalar_select %p151_p7, %s1655_s17, %s153_s24  }
   0xd   : > { %p225_p10 = pnand %p1225_p6, %p224_p9 }
   0xe   : > { %v1565_v0 = vld [vmem:[%s1951_s1] sm:$0xff] (!%p225_p10)   ;;  %s1227_s5 = sshll.u32 (!%p225_p10), %s1659_s18, 5  ;;  %v1566_v1 = vld [vmem:[%s1951_s1 + $0x8] sm:$0xff] (!%p225_p10)   ;;  %v1567_v2 = vld [vmem:[%s1951_s1 + $0x10] sm:$0xff] (!%p225_p10)   ;;  %s264_s12 = sand.u32 (!%p225_p10), 1, %s1651_s16  }
   0xf   : > { %228 = sbr.rel (%p225_p10) target bundleno = 310 (0x136), region = 36  ;;  %p268_p11 = scmp.lt.s32.totalorder (!%p225_p10), %s1227_s5, 255  ;;  %1444 = vmatprep.subr.bf16.mxu0 (!%p225_p10), %v1565_v0  ;;  %1492 = vmatprep.subr.bf16.mxu1 (!%p225_p10), %v1565_v0  ;;  %v1568_v3 = vld [vmem:[%s1951_s1 + $0x18] sm:$0xff] (!%p225_p10)   ;;  %v1569_v6 = vld [vmem:[%s1951_s1 + $0x20] sm:$0xff] (!%p225_p10)   ;;  %v1570_v7 = vld [vmem:[%s1951_s1 + $0x28] sm:$0xff] (!%p225_p10)  }
  0x10   : > { %1445 = vmatpush3.bf16.msra.mxu0 (!%p225_p10), %v1565_v0  ;;  %1500 = vmatpush3.bf16.msra.mxu1 (!%p225_p10), %v1565_v0  ;;  %v1571_v8 = vld [vmem:[%s1951_s1 + $0x30] sm:$0xff] (!%p225_p10)   ;;  %v1572_v9 = vld [vmem:[%s1951_s1 + $0x38] sm:$0xff] (!%p225_p10)   ;;  %v1801_v24 = vld [vmem:[%s1952_s2] ss:$0 sm:$0xff] (!%p225_p10)  ;;  %s1324_s21 = sshll.u32 (!%p225_p10), %s1659_s18, 11  ;;  %s1904_s29 = scalar_lea.sflag (!%p225_p10), [#allocation4], %s264_s12 }
  0x11   : > { %1446 = vmatprep.subr.bf16.mxu0 (!%p225_p10), %v1566_v1  ;;  %1493 = vmatprep.subr.bf16.mxu1 (!%p225_p10), %v1566_v1  ;;  %v1806_v26 = vld [vmem:[%s1953_s3] ss:$0 sm:$0xff] (!%p225_p10)  ;;  %s1894_s18 = scalar_lea.hbm (!%p225_p10), %s1954_s4, %s1324_s21 }
  0x14   : > { %1447 = vmatpush3.bf16.msra.mxu0 (!%p225_p10), %v1566_v1  ;;  %1501 = vmatpush3.bf16.msra.mxu1 (!%p225_p10), %v1566_v1 }
  0x15   : > { %1448 = vmatprep.subr.bf16.mxu0 (!%p225_p10), %v1567_v2  ;;  %1494 = vmatprep.subr.bf16.mxu1 (!%p225_p10), %v1567_v2 }
  0x16   : > { %s1965_s5 = smov (!%p268_p11, %s1227_s5), 255 }
  0x17   : > { %s1228_s10 = sshll.u32 %s1965_s5, 2  ;;  %s1669_s5 = smov [#allocation3]  }
  0x18   : > { %s1765_s13 = scalar_lea.vmem %s1950_s0, %s1228_s10  ;;  %1449 = vmatpush3.bf16.msra.mxu0 %v1567_v2  ;;  %1502 = vmatpush3.bf16.msra.mxu1 %v1567_v2  ;;  %s1593_s6 = sshll.u32 %s1669_s5, 4  ;;  %s1594_s6 = int_to_ptr.vmem [resolvable:$false] %s1593_s6 }
  0x19   : > { %v1573_v4 = vld [vmem:[%s1765_s13] sm:$0xff]   ;;  %1450 = vmatprep.subr.bf16.mxu0 %v1568_v3  ;;  %1495 = vmatprep.subr.bf16.mxu1 %v1568_v3  ;;  %v1575_v10 = vld [vmem:[%s1765_s13 + $0x8] sm:$0xff]   ;;  %v1577_v12 = vld [vmem:[%s1765_s13 + $0x10] sm:$0xff]   ;;  %s1595_s7 = scalar_lea.vmem %s1594_s6, 4096 }
  0x1a   : > { %v1574_v5 = vld [vmem:[%s1765_s13 + $0x40] sm:$0xff]   ;;  %1460 = vmatprep.mubr.bf16.mxu0 %v1573_v4  ;;  %v1576_v11 = vld [vmem:[%s1765_s13 + $0x48] sm:$0xff]   ;;  %v1578_v13 = vld [vmem:[%s1765_s13 + $0x50] sm:$0xff]  }
  0x1b   : > { %1476 = vmatprep.mubr.bf16.mxu1 %v1574_v5  ;;  %v1579_v14 = vld [vmem:[%s1765_s13 + $0x18] sm:$0xff]   ;;  %v1581_v16 = vld [vmem:[%s1765_s13 + $0x20] sm:$0xff]   ;;  %v1583_v18 = vld [vmem:[%s1765_s13 + $0x28] sm:$0xff]  }
  0x1c   : > { %1451 = vmatpush3.bf16.msra.mxu0 %v1568_v3  ;;  %1503 = vmatpush3.bf16.msra.mxu1 %v1568_v3  ;;  %v1580_v15 = vld [vmem:[%s1765_s13 + $0x58] sm:$0xff]   ;;  %v1582_v17 = vld [vmem:[%s1765_s13 + $0x60] sm:$0xff]   ;;  %v1584_v19 = vld [vmem:[%s1765_s13 + $0x68] sm:$0xff]  }
  0x1d   : > { %1452 = vmatprep.subr.bf16.mxu0 %v1569_v6  ;;  %1496 = vmatprep.subr.bf16.mxu1 %v1569_v6  ;;  %v1585_v20 = vld [vmem:[%s1765_s13 + $0x30] sm:$0xff]   ;;  %v1587_v22 = vld [vmem:[%s1765_s13 + $0x38] sm:$0xff]  }
  0x1e   : > { %v1586_v21 = vld [vmem:[%s1765_s13 + $0x70] sm:$0xff]   ;;  %v1588_v23 = vld [vmem:[%s1765_s13 + $0x78] sm:$0xff]   ;;  %s1226_s13 = sshll.u32 %s264_s12, 7 }
  0x1f   : > { %s1831_s14 = scalar_lea.vmem [#allocation3], %s1226_s13 }
  0x20   : > { %1453 = vmatpush3.bf16.msra.mxu0 %v1569_v6  ;;  %1504 = vmatpush3.bf16.msra.mxu1 %v1569_v6  ;;  %s1098_s22 = sshll.u32 %s1831_s14, 4  ;;  %s1896_s22 = int_to_ptr.vmem [resolvable:$true] %s1098_s22 }
  0x21   : > { %1454 = vmatprep.subr.bf16.mxu0 %v1570_v7  ;;  %1497 = vmatprep.subr.bf16.mxu1 %v1570_v7  ;;  %s1589_s30 = scalar_lea.vmem %s1896_s22, 2048  ;;  %p1596_p1 = scmp.lt.s32.totalorder %s1896_s22, %s1594_s6 }
  0x22   : > { %p1590_p12 = scmp.ne.s32.totalorder %s1896_s22, %s1589_s30  ;;  %p1597_p2 = scmp.lt.s32.totalorder %s1595_s7, %s1589_s30 }
  0x24   : > { %1455 = vmatpush3.bf16.msra.mxu0 %v1570_v7  ;;  %1505 = vmatpush3.bf16.msra.mxu1 %v1570_v7  ;;  %p1591_p13 = pnand %p1590_p12, %p1737_p4  ;;  %p1598_p3 = por %p1597_p2, %p1596_p1 }
  0x25   : > { %1456 = vmatprep.subr.bf16.mxu0 %v1571_v8  ;;  %1498 = vmatprep.subr.bf16.mxu1 %v1571_v8 }
  0x26   : > { %p1592_p0 = pneg %p1591_p13 }
  0x28   : > { %1457 = vmatpush3.bf16.msra.mxu0 %v1571_v8  ;;  %1506 = vmatpush3.bf16.msra.mxu1 %v1571_v8  ;;  %p1599_p5 = pnand %p1598_p3, %p1592_p0 }
  0x29   : > { %1458 = vmatprep.subr.bf16.mxu0 %v1572_v9  ;;  %1499 = vmatprep.subr.bf16.mxu1 %v1572_v9 }
  0x2c   : > { %1459 = vmatpush3.bf16.msra.mxu0 %v1572_v9  ;;  %1507 = vmatpush3.bf16.msra.mxu1 %v1572_v9 }
  0x2f   : > { %1461 = vmatmul.mubr.bf16.vlgmr.msra.gmra.mrb[0].mxu0 %v1575_v10  ;;  %1477 = vmatmul.mubr.bf16.vlgmr.msra.gmra.mrb[0].mxu1 %v1576_v11 }
  0x30   : > { %1464 = vmatprep.mubr.bf16.mxu0 %v1577_v12  ;;  %1480 = vmatprep.mubr.bf16.mxu1 %v1578_v13 }
  0x37   : > { %1465 = vmatmul.mubr.bf16.gmra.mrb[4].mxu0 %v1579_v14  ;;  %1481 = vmatmul.mubr.bf16.gmra.mrb[4].mxu1 %v1580_v15 }
  0x38   : > { %1468 = vmatprep.mubr.bf16.mxu0 %v1581_v16  ;;  %1484 = vmatprep.mubr.bf16.mxu1 %v1582_v17 }
  0x3f   : > { %1469 = vmatmul.mubr.bf16.gmra.mrb[8].mxu0 %v1583_v18  ;;  %1485 = vmatmul.mubr.bf16.gmra.mrb[8].mxu1 %v1584_v19 }
  0x40   : > { %1472 = vmatprep.mubr.bf16.mxu0 %v1585_v20  ;;  %1488 = vmatprep.mubr.bf16.mxu1 %v1586_v21 }
  0x47   : > { %1473 = vmatmul.mubr.bf16.gmra.mrb[12].mxu0 %v1587_v22  ;;  %1489 = vmatmul.mubr.bf16.gmra.mrb[12].mxu1 %v1588_v23 }
 0x102   : > { %v1462_v25 = vpop.f32.mrb[0].mxu0  ;;  %v1478_v27 = vpop.f32.mrb[0].mxu1 }
 0x103   : > { %v822_v28 = vmul.f32 %v1462_v25, %v1801_v24  ;;  %v838_v29 = vmul.f32 %v1478_v27, %v1801_v24  ;;  %v587_v30 = vpop.f32.mrb[1].mxu0  ;;  %v651_v31 = vpop.f32.mrb[1].mxu1 }
 0x104   : > { %v820_v32 = vmul.f32 %v1801_v24, %v587_v30  ;;  %v836_v33 = vmul.f32 %v1801_v24, %v651_v31  ;;  %v1463_v34 = vpop.f32.mrb[2].mxu0  ;;  %v1479_v35 = vpop.f32.mrb[2].mxu1 }
 0x105   : > { %v861_v36 = vadd.f32 %v1806_v26, %v822_v28  ;;  %v877_v37 = vadd.f32 %v1806_v26, %v838_v29  ;;  %v823_v38 = vmul.f32 %v1463_v34, %v1801_v24  ;;  %v839_v39 = vmul.f32 %v1479_v35, %v1801_v24  ;;  %v590_v40 = vpop.f32.mrb[3].mxu0  ;;  %v654_v41 = vpop.f32.mrb[3].mxu1 }
 0x106   : > { %v859_v42 = vadd.f32 %v1806_v26, %v820_v32  ;;  %v875_v43 = vadd.f32 %v1806_v26, %v836_v33  ;;  %v821_v44 = vmul.f32 %v1801_v24, %v590_v40  ;;  %v837_v45 = vmul.f32 %v1801_v24, %v654_v41 }
 0x107   : > { %v862_v46 = vadd.f32 %v1806_v26, %v823_v38  ;;  %v878_v47 = vadd.f32 %v1806_v26, %v839_v39  ;;  %v893_v50 = vmax.f32 %v861_v36, 0.0  ;;  %v909_v51 = vmax.f32 %v877_v37, 0.0 }
 0x108   : > { %v860_v48 = vadd.f32 %v1806_v26, %v821_v44  ;;  %v876_v49 = vadd.f32 %v1806_v26, %v837_v45  ;;  %v891_v54 = vmax.f32 %v859_v42, 0.0  ;;  %v907_v55 = vmax.f32 %v875_v43, 0.0 }
 0x109   : > { %v894_v52 = vmax.f32 %v862_v46, 0.0  ;;  %v910_v53 = vmax.f32 %v878_v47, 0.0 }
 0x10a   : > { %v892_v56 = vmax.f32 %v860_v48, 0.0  ;;  %v908_v57 = vmax.f32 %v876_v49, 0.0  ;;  %v1466_v58 = vpop.f32.mrb[4].mxu0  ;;  %v1482_v59 = vpop.f32.mrb[4].mxu1 }
 0x10b   : > { %v1333_v60 = vpack.c.bf16 %v894_v52, %v893_v50  ;;  %v1373_v61 = vpack.c.bf16 %v910_v53, %v909_v51  ;;  %v826_v62 = vmul.f32 %v1466_v58, %v1801_v24  ;;  %v842_v63 = vmul.f32 %v1482_v59, %v1801_v24  ;;  %v603_v0 = vpop.f32.mrb[5].mxu0  ;;  %v667_v1 = vpop.f32.mrb[5].mxu1 }
 0x10c   : > { %v1328_v2 = vpack.c.bf16 %v892_v56, %v891_v54  ;;  %v1368_v3 = vpack.c.bf16 %v908_v57, %v907_v55  ;;  %v824_v4 = vmul.f32 %v1801_v24, %v603_v0  ;;  %v840_v5 = vmul.f32 %v1801_v24, %v667_v1  ;;  %v1467_v6 = vpop.f32.mrb[6].mxu0  ;;  %v1483_v7 = vpop.f32.mrb[6].mxu1 }
 0x10d   : > { %1405 = vst [vmem:[%s1831_s14 + $0x8] sm:$0xff] %v1333_v60   ;;  %1413 = vst [vmem:[%s1831_s14 + $0x48] sm:$0xff] %v1373_v61   ;;  %v865_v8 = vadd.f32 %v1806_v26, %v826_v62  ;;  %v881_v9 = vadd.f32 %v1806_v26, %v842_v63  ;;  %v827_v10 = vmul.f32 %v1467_v6, %v1801_v24  ;;  %v606_v12 = vpop.f32.mrb[7].mxu0  ;;  %v670_v13 = vpop.f32.mrb[7].mxu1 }
 0x10e   : > { %v843_v11 = vmul.f32 %v1483_v7, %v1801_v24  ;;  %1329 = vst [vmem:[%s1831_s14] sm:$0xff] %v1328_v2   ;;  %1412 = vst [vmem:[%s1831_s14 + $0x40] sm:$0xff] %v1368_v3   ;;  %v863_v14 = vadd.f32 %v1806_v26, %v824_v4  ;;  %v879_v15 = vadd.f32 %v1806_v26, %v840_v5 }
 0x10f   : > { %v825_v16 = vmul.f32 %v1801_v24, %v606_v12  ;;  %v841_v17 = vmul.f32 %v1801_v24, %v670_v13  ;;  %v866_v18 = vadd.f32 %v1806_v26, %v827_v10  ;;  %v897_v22 = vmax.f32 %v865_v8, 0.0 }
 0x110   : > { %v882_v19 = vadd.f32 %v1806_v26, %v843_v11  ;;  %v913_v23 = vmax.f32 %v881_v9, 0.0  ;;  %v895_v28 = vmax.f32 %v863_v14, 0.0  ;;  %v911_v29 = vmax.f32 %v879_v15, 0.0 }
 0x111   : > { %v864_v20 = vadd.f32 %v1806_v26, %v825_v16  ;;  %v880_v21 = vadd.f32 %v1806_v26, %v841_v17  ;;  %v898_v25 = vmax.f32 %v866_v18, 0.0 }
 0x112   : > { %v914_v27 = vmax.f32 %v882_v19, 0.0  ;;  %v1470_v32 = vpop.f32.mrb[8].mxu0  ;;  %v1486_v33 = vpop.f32.mrb[8].mxu1 }
 0x113   : > { %v896_v30 = vmax.f32 %v864_v20, 0.0  ;;  %v912_v31 = vmax.f32 %v880_v21, 0.0  ;;  %v1343_v34 = vpack.c.bf16 %v898_v25, %v897_v22  ;;  %v830_v36 = vmul.f32 %v1470_v32, %v1801_v24  ;;  %v619_v38 = vpop.f32.mrb[9].mxu0  ;;  %v683_v39 = vpop.f32.mrb[9].mxu1 }
 0x114   : > { %v1383_v35 = vpack.c.bf16 %v914_v27, %v913_v23  ;;  %v846_v37 = vmul.f32 %v1486_v33, %v1801_v24  ;;  %v828_v42 = vmul.f32 %v1801_v24, %v619_v38  ;;  %v844_v43 = vmul.f32 %v1801_v24, %v683_v39  ;;  %v1471_v44 = vpop.f32.mrb[10].mxu0  ;;  %v1487_v45 = vpop.f32.mrb[10].mxu1 }
 0x115   : > { %v1338_v40 = vpack.c.bf16 %v896_v30, %v895_v28  ;;  %v1378_v41 = vpack.c.bf16 %v912_v31, %v911_v29  ;;  %1407 = vst [vmem:[%s1831_s14 + $0x18] sm:$0xff] %v1343_v34   ;;  %v869_v46 = vadd.f32 %v1806_v26, %v830_v36  ;;  %v831_v48 = vmul.f32 %v1471_v44, %v1801_v24  ;;  %v622_v50 = vpop.f32.mrb[11].mxu0  ;;  %v686_v51 = vpop.f32.mrb[11].mxu1 }
 0x116   : > { %1415 = vst [vmem:[%s1831_s14 + $0x58] sm:$0xff] %v1383_v35   ;;  %v885_v47 = vadd.f32 %v1806_v26, %v846_v37  ;;  %v847_v49 = vmul.f32 %v1487_v45, %v1801_v24  ;;  %v867_v52 = vadd.f32 %v1806_v26, %v828_v42  ;;  %v883_v53 = vadd.f32 %v1806_v26, %v844_v43 }
 0x117   : > { %1406 = vst [vmem:[%s1831_s14 + $0x10] sm:$0xff] %v1338_v40   ;;  %1414 = vst [vmem:[%s1831_s14 + $0x50] sm:$0xff] %v1378_v41   ;;  %v829_v54 = vmul.f32 %v1801_v24, %v622_v50  ;;  %v845_v55 = vmul.f32 %v1801_v24, %v686_v51  ;;  %v870_v56 = vadd.f32 %v1806_v26, %v831_v48  ;;  %v901_v60 = vmax.f32 %v869_v46, 0.0 }
 0x118   : > { %v886_v57 = vadd.f32 %v1806_v26, %v847_v49  ;;  %v917_v61 = vmax.f32 %v885_v47, 0.0  ;;  %v899_v0 = vmax.f32 %v867_v52, 0.0  ;;  %v915_v1 = vmax.f32 %v883_v53, 0.0 }
 0x119   : > { %v868_v58 = vadd.f32 %v1806_v26, %v829_v54  ;;  %v884_v59 = vadd.f32 %v1806_v26, %v845_v55  ;;  %v902_v62 = vmax.f32 %v870_v56, 0.0 }
 0x11a   : > { %v918_v63 = vmax.f32 %v886_v57, 0.0  ;;  %v1474_v4 = vpop.f32.mrb[12].mxu0  ;;  %v1490_v5 = vpop.f32.mrb[12].mxu1 }
 0x11b   : > { %v900_v2 = vmax.f32 %v868_v58, 0.0  ;;  %v916_v3 = vmax.f32 %v884_v59, 0.0  ;;  %v1353_v6 = vpack.c.bf16 %v902_v62, %v901_v60  ;;  %v834_v8 = vmul.f32 %v1474_v4, %v1801_v24  ;;  %v635_v10 = vpop.f32.mrb[13].mxu0  ;;  %v699_v11 = vpop.f32.mrb[13].mxu1 }
 0x11c   : > { %v1393_v7 = vpack.c.bf16 %v918_v63, %v917_v61  ;;  %v850_v9 = vmul.f32 %v1490_v5, %v1801_v24  ;;  %v832_v14 = vmul.f32 %v1801_v24, %v635_v10  ;;  %v848_v15 = vmul.f32 %v1801_v24, %v699_v11  ;;  %v1475_v16 = vpop.f32.mrb[14].mxu0  ;;  %v1491_v17 = vpop.f32.mrb[14].mxu1 }
 0x11d   : > { %v1348_v12 = vpack.c.bf16 %v900_v2, %v899_v0  ;;  %v1388_v13 = vpack.c.bf16 %v916_v3, %v915_v1  ;;  %1409 = vst [vmem:[%s1831_s14 + $0x28] sm:$0xff] %v1353_v6   ;;  %v873_v18 = vadd.f32 %v1806_v26, %v834_v8  ;;  %v835_v20 = vmul.f32 %v1475_v16, %v1801_v24  ;;  %v638_v22 = vpop.f32.mrb[15].mxu0  ;;  %v702_v23 = vpop.f32.mrb[15].mxu1 }
 0x11e   : > { %1417 = vst [vmem:[%s1831_s14 + $0x68] sm:$0xff] %v1393_v7   ;;  %v889_v19 = vadd.f32 %v1806_v26, %v850_v9  ;;  %v851_v21 = vmul.f32 %v1491_v17, %v1801_v24  ;;  %v871_v25 = vadd.f32 %v1806_v26, %v832_v14  ;;  %v887_v27 = vadd.f32 %v1806_v26, %v848_v15 }
 0x11f   : > { %1408 = vst [vmem:[%s1831_s14 + $0x20] sm:$0xff] %v1348_v12   ;;  %1416 = vst [vmem:[%s1831_s14 + $0x60] sm:$0xff] %v1388_v13   ;;  %v833_v28 = vmul.f32 %v1801_v24, %v638_v22  ;;  %v849_v29 = vmul.f32 %v1801_v24, %v702_v23  ;;  %v874_v30 = vadd.f32 %v1806_v26, %v835_v20  ;;  %v905_v34 = vmax.f32 %v873_v18, 0.0 }
 0x120   : > { %v890_v31 = vadd.f32 %v1806_v26, %v851_v21  ;;  %v921_v35 = vmax.f32 %v889_v19, 0.0  ;;  %v903_v24 = vmax.f32 %v871_v25, 0.0  ;;  %v919_v38 = vmax.f32 %v887_v27, 0.0 }
 0x121   : > { %v872_v32 = vadd.f32 %v1806_v26, %v833_v28  ;;  %v888_v33 = vadd.f32 %v1806_v26, %v849_v29  ;;  %v906_v36 = vmax.f32 %v874_v30, 0.0 }
 0x122   : > { %v922_v37 = vmax.f32 %v890_v31, 0.0 }
 0x123   : > { %v904_v39 = vmax.f32 %v872_v32, 0.0  ;;  %v920_v40 = vmax.f32 %v888_v33, 0.0  ;;  %v1363_v41 = vpack.c.bf16 %v906_v36, %v905_v34 }
 0x124   : > { %v1403_v42 = vpack.c.bf16 %v922_v37, %v921_v35 }
 0x125   : > { %v1358_v26 = vpack.c.bf16 %v904_v39, %v903_v24  ;;  %v1398_v43 = vpack.c.bf16 %v920_v40, %v919_v38  ;;  %1411 = vst [vmem:[%s1831_s14 + $0x38] sm:$0xff] %v1363_v41  }
 0x126   : > { %1419 = vst [vmem:[%s1831_s14 + $0x78] sm:$0xff] %v1403_v42  }
 0x127   : > { %1410 = vst [vmem:[%s1831_s14 + $0x30] sm:$0xff] %v1358_v26   ;;  %1418 = vst [vmem:[%s1831_s14 + $0x70] sm:$0xff] %v1398_v43  }
 0x128   : > { %1602 = shalt.err (!%p1599_p5)
}
 0x129   : > { %s1603_s8 = scalar_lea.hbm %s1894_s18, 2048  ;;  %s1607_s11 = scalar_lea.hbm %s1954_s4, 16384 }
 0x12a   : > { %p1604_p6 = scmp.ne.s32.totalorder %s1894_s18, %s1603_s8  ;;  %p1608_p10 = scmp.lt.u32.totalorder %s1894_s18, %s1954_s4 }
 0x12b   : > { %p1609_p11 = scmp.lt.u32.totalorder %s1607_s11, %s1603_s8  ;;  %p1611_p13 = scmp.lt.u32.totalorder %s1603_s8, %s1894_s18 }
 0x12c   : > { %p1605_p7 = pnand %p1604_p6, %p1737_p4 }
 0x12d   : > { %p1610_p12 = por %p1609_p11, %p1608_p10 }
 0x12e   : > { %p1606_p9 = pneg %p1605_p7 }
 0x12f   : > { %p1612_p0 = por %p1611_p13, %p1610_p12 }
 0x131   : > { %p1613_p1 = pnand %p1612_p0, %p1606_p9 }
 0x133   : > { %1616 = shalt.err (!%p1613_p1)
}
 0x134   : > { %s1670_s14 = smov 64   ;;  %s1671_s21 = smov 4  }
 0x135   : > { %1508 = dma.vmem_to_hbm [thread:$0]  (%p1737_p4), %s1896_s22, 2048, %s1894_s18, %s1904_s29, %s1670_s14, %s1670_s14, %s1671_s21  }
 0x136 PF: > { %p1514_p2 = scmp.ge.s32.totalorder %s1667_s20, 2  ;;  %s1113_s24 = sand.u32 1, %s1647_s15  }
 0x137   : > { %s1114_s26 = scalar_lea.sflag [#allocation4], %s1113_s24 }
 0x138   : > { %p1511_p3 = pnand %p1514_p2, %p1744_p8 }
 0x13a   : > { %1642 = dma.done.wait (!%p1511_p3), %s1114_s26, 2048  }
 0x13b   : > { %1644 = vsyncadd (!%p1511_p3), %s1114_s26, 4294965248  ;;  %s17_s20 = sadd.s32 1, %s1667_s20   ;;  %s1957_s15 = smov %s1651_s16 }
 0x13c   : > { %p14_p5 = scmp.ge.s32.totalorder %s17_s20, 10   ;;  %s1958_s16 = smov %s1655_s17 }
 0x13d   : > { %s1959_s17 = smov %s1750_s28  ;;  %s1960_s18 = smov %s1663_s19 }
 0x13e   : > { %s1961_s19 = smov %s1963_s23  ;;  %16 = sbr.rel (!%p14_p5) target bundleno = 4 (0x4), region = 88 }
 0x145   :  { %1119 = vsyncpa [#allocation4], 1 }
 0x146   :  { %1121 = vsyncpa [#allocation4 + $0x1], 1 }

</bundles_post_ra>
